<compile_context>
chip_gen: v7x
topology: tpu7x:2x2x1
jax: 0.10.0
libtpu: 0.0.40
codegen_flags: <defaults>
</compile_context>

<pallas_src>
import numpy as np

import jax
import jax.numpy as jnp
from jax.experimental import pallas as pl
from jax.experimental.pallas import tpu as pltpu


def _vmem_limit_bytes():
    """Generation-aware VMEM budget: ~3/4 of per-core VMEM, capped at 96 MiB."""
    try:
        cap = int(pltpu.get_tpu_info().vmem_capacity_bytes)
    except Exception:
        cap = 64 << 20          # conservative fallback (v7x per-TensorCore size)
    return min((cap * 3) // 4, 96 << 20)   # 48 MiB on v7x, 96 MiB on v5e/v6e


def _pick_group(n_rows, Wo, KW, itemsize, max_row_bytes):
    """Pooled rows packed per slab row so the output last dim g*Wo reaches >= 128
    lanes (unmasked stores, wide output DMAs).  g must divide n_rows exactly."""
    if Wo >= 128 or n_rows <= 1:
        return 1
    ideal = -(-128 // Wo)                               # ceil(128 / Wo)
    ideal = min(ideal, n_rows)
    hi = min(n_rows, ideal * 4)
    for g in range(ideal, hi + 1):                      # smallest divisor >= ideal
        if n_rows % g == 0 and g * KW * itemsize <= max_row_bytes:
            return g
    for g in range(ideal, 0, -1):                       # else largest divisor <= ideal
        if n_rows % g == 0:
            return g
    return 1


def _pick_tile_rows(n_rows, per_row_bytes, budget_bytes, sublane_mult, prefer_steps=4):
    """Largest row tile (multiple of the dtype's sublane packing) fitting the
    double-buffered VMEM budget.  Prefers >= prefer_steps grid steps (so both
    v7x TensorCores get >= 2 steps) and an evenly-dividing tile, but never one
    below cap/2 (avoids the R = 8*prime degenerate tiny-divisor case)."""
    m = sublane_mult
    if n_rows <= m:
        return n_rows                                   # block == full extent: legal
    cap = (budget_bytes // max(per_row_bytes, 1)) // m * m
    cap = max(m, min(cap, n_rows))
    if cap >= n_rows:                                   # whole slab fits in one step
        cap = max(m, (n_rows // prefer_steps) // m * m)
    lo = max(m, (cap // 2) // m * m)
    for t in range(cap, lo - 1, -m):
        if n_rows % t == 0:
            return t
    return cap              # padded trailing block; rows are independent -> safe


def _build_pool_matrix(k, W, Wo, group, prereduce):
    """Static 0/1 pooling pattern matrix, built host-side in numpy."""
    if prereduce:
        col = np.arange(W) // k                         # (W,)   after k-row pre-reduce
    else:
        col = (np.arange(k * W) % W) // k               # (k*W,) full k x k window
    base = (col[:, None] == np.arange(Wo)[None, :]).astype(np.float32)
    if group > 1:
        base = np.kron(np.eye(group, dtype=np.float32), base)   # block diagonal
    return base


def _make_kernel(k, W, prereduce):
    def kernel(x_ref, p_ref, o_ref):
        x = x_ref[...].astype(jnp.float32)              # squares in f32 on the VPU
        if prereduce:
            # VPU pre-reduction of the k row-groups: k-1 aligned lane-slice adds
            # (W % 128 == 0 guaranteed by the caller), MXU contraction shrinks to W.
            ssq = x[:, 0:W] * x[:, 0:W]
            for j in range(1, k):
                xj = x[:, j * W:(j + 1) * W]
                ssq = ssq + xj * xj
        else:
            ssq = x * x
        ssq = ssq.astype(p_ref.dtype)                   # optional bf16 MXU operands
        acc = jnp.dot(ssq, p_ref[...], preferred_element_type=jnp.float32)  # MXU pooling
        o_ref[...] = jnp.sqrt(acc).astype(o_ref.dtype)                      # EUP sqrt
    return kernel


def norm_pool2(x, kernel_size, stride, *, use_bf16_matmul=False):
    """Forward of NormPool2: out[n,c,i,j] = ||x[n, c, i*k:(i+1)*k, j*k:(j+1)*k]||_2."""
    assert kernel_size == stride, "Invalid pool parameters"
    k = int(kernel_size)
    N, C, H, W = x.shape
    assert H % k == 0 and W % k == 0, "H, W must be divisible by kernel_size"
    Ho, Wo = H // k, W // k
    R = N * C * Ho                       # one pooled output row per (n, c, ho)
    KW = k * W
    itemsize = jnp.dtype(x.dtype).itemsize
    sublane_mult = max(8, 32 // itemsize)      # 8 (f32) / 16 (bf16) / 32 (int8|fp8)

    vmem_limit = _vmem_limit_bytes()

    # Lane-dense output grouping (only kicks in when Wo < 128).
    g = _pick_group(R, Wo, KW, itemsize,
                    max_row_bytes=max(KW * itemsize, vmem_limit // (8 * sublane_mult)))
    Rg = R // g
    in_width = g * KW
    out_width = g * Wo

    # k-row VPU pre-reduction when slices are 128-aligned and no grouping is used.
    prereduce = (g == 1) and (k > 1) and (W % 128 == 0)

    p_dtype = jnp.bfloat16 if use_bf16_matmul else jnp.float32
    p_np = _build_pool_matrix(k, W, Wo, g, prereduce)
    p = jnp.asarray(p_np, dtype=p_dtype)                # 0/1 values: exact in bf16
    p_bytes = p_np.size * jnp.dtype(p_dtype).itemsize

    # VMEM budget: double-buffered in/out blocks + 2 buffers for P (its block
    # index is constant so it is only DMA'd once, but it is still allocated
    # double-buffered) + 2 MiB headroom for compiler-internal scratch.
    per_row_bytes = 2 * (in_width + out_width) * itemsize
    block_budget = vmem_limit - 2 * p_bytes - (2 << 20)
    block_budget = max(block_budget, sublane_mult * per_row_bytes)
    tile_r = _pick_tile_rows(Rg, per_row_bytes, block_budget, sublane_mult,
                             prefer_steps=4)
    grid = (pl.cdiv(Rg, tile_r),)

    # Metadata-only (contiguous) reshape: each slab row holds the g*k input rows
    # feeding g consecutive pooled output rows.
    x2d = x.reshape(Rg, in_width)

    contraction = W if prereduce else in_width
    cost = pl.CostEstimate(
        flops=2 * Rg * contraction * out_width + N * C * H * W,  # MXU MACs + VPU squares
        transcendentals=N * C * Ho * Wo,                         # one sqrt per output
        bytes_accessed=x2d.size * itemsize + p_bytes + Rg * out_width * itemsize,
    )

    out2d = pl.pallas_call(
        _make_kernel(k, W, prereduce),
        out_shape=jax.ShapeDtypeStruct((Rg, out_width), x.dtype),
        grid_spec=pltpu.PrefetchScalarGridSpec(
            num_scalar_prefetch=0,
            grid=grid,
            in_specs=[
                pl.BlockSpec((tile_r, in_width), lambda i: (i, 0)),
                # constant block index -> fetched once, not re-DMA'd per grid step
                pl.BlockSpec(p_np.shape, lambda i: (0, 0)),
            ],
            out_specs=pl.BlockSpec((tile_r, out_width), lambda i: (i, 0)),
        ),
        compiler_params=pltpu.CompilerParams(
            dimension_semantics=("parallel",),      # row tiles shard across v7x cores
            vmem_limit_bytes=vmem_limit,
        ),
        cost_estimate=cost,
    )(x2d, p)

    # metadata-only reshape back to pooled NCHW
    return out2d.reshape(N, C, Ho, Wo)


# TODO(synk): custom autograd backward (NormPool2Custom.backward) is not implemented;
# this covers the forward pass only.


if __name__ == "__main__":
    key = jax.random.PRNGKey(0)
    N, C, H, W = 2, 4, 16, 16
    kernel_size = 2
    stride = 2

    x = jax.random.normal(key, (N, C, H, W), dtype=jnp.float32)

    y = norm_pool2(x, kernel_size, stride)
    y = jax.block_until_ready(y)

    # pure-JAX reference mirroring the PyTorch forward exactly
    xr = x.reshape(N, C, H // kernel_size, kernel_size, W // kernel_size, kernel_size)
    y_ref = jnp.sqrt(jnp.sum(xr * xr, axis=(3, 5)))

    assert y.shape == (N, C, H // kernel_size, W // kernel_size), y.shape
    assert y.dtype == x.dtype
    assert jnp.allclose(y, y_ref, atol=1e-5, rtol=1e-5), "mismatch vs reference"

    print("KERNEL_OK")
</pallas_src>

<mosaic_0001>
module attributes {stable_mosaic.version = 11 : i64} {
  func.func @kernel(%arg0: i32, %arg1: memref<4x512xf32, #tpu.memory_space<vmem>>, %arg2: memref<512x128xf32, #tpu.memory_space<vmem>>, %arg3: memref<4x128xf32, #tpu.memory_space<vmem>>) attributes {dimension_semantics = [#tpu.dimension_semantics<parallel>], iteration_bounds = array<i64: 1>, scalar_prefetch = 0 : i64, scratch_operands = 0 : i64, tpu.core_type = #tpu.core_type<tc>, window_params = [{transform_indices = @transform_0, window_bounds = array<i64: 4, 512>}, {pipeline_mode = #tpu.pipeline_mode<synchronous>, transform_indices = @transform_1, window_bounds = array<i64: 512, 128>}, {transform_indices = @transform_2, window_bounds = array<i64: 4, 128>}]} {
    %c0 = arith.constant 0 : index
    %c0_0 = arith.constant 0 : index
    %0 = vector.load %arg1[%c0, %c0_0] : memref<4x512xf32, #tpu.memory_space<vmem>>, vector<4x512xf32>
    %1 = arith.mulf %0, %0 : vector<4x512xf32>
    %c0_1 = arith.constant 0 : index
    %c0_2 = arith.constant 0 : index
    %2 = vector.load %arg2[%c0_1, %c0_2] : memref<512x128xf32, #tpu.memory_space<vmem>>, vector<512x128xf32>
    %cst = arith.constant dense<0.000000e+00> : vector<4x128xf32>
    %3 = tpu.matmul %1, %2, %cst {dimension_numbers = #tpu.dot_dimension_numbers<[1], [0], [0], [1], [0, 0, 1, 1], [], []>} : vector<4x512xf32>, vector<512x128xf32>, vector<4x128xf32> -> vector<4x128xf32>
    %4 = math.sqrt %3 : vector<4x128xf32>
    %c0_3 = arith.constant 0 : index
    %c0_4 = arith.constant 0 : index
    %5 = vector.load %arg3[%c0_3, %c0_4] : memref<4x128xf32, #tpu.memory_space<vmem>>, vector<4x128xf32>
    tpu.vector_store %arg3[%c0_3, %c0_4], %4 {strides = array<i32>} : memref<4x128xf32, #tpu.memory_space<vmem>>, vector<4x128xf32>,
    return
  }
  func.func @transform_0(%arg0: i32) -> (i32, i32) {
    %c0_i32 = arith.constant 0 : i32
    %c0_i32_0 = arith.constant 0 : i32
    return %arg0, %c0_i32 : i32, i32
  }
  func.func @transform_1(%arg0: i32) -> (i32, i32) {
    %c0_i32 = arith.constant 0 : i32
    %c0_i32_0 = arith.constant 0 : i32
    %c0_i32_1 = arith.constant 0 : i32
    return %c0_i32, %c0_i32_0 : i32, i32
  }
  func.func @transform_2(%arg0: i32) -> (i32, i32) {
    %c0_i32 = arith.constant 0 : i32
    %c0_i32_0 = arith.constant 0 : i32
    return %arg0, %c0_i32 : i32, i32
  }
}

</mosaic_0001>

<bundles_post_ra>
// kernel: tpu_custom_call.1
= control target key start
LH: loop header
LB: loop body
LE: loop exit
PB: predicated region body
PF: predicated region fallthrough
CT: control target
= control target key end

     0   :  { %7 = vsyncpa [#allocation3], 0  ;;  %s552_s0 = inlined_call_operand.hbm [shape: f32[4,512], index: 0, kind: input, shape index: {}]   ;;  %s553_s1 = inlined_call_operand.hbm [shape: f32[512,128], index: 1, kind: input, shape index: {}]   ;;  %s554_s2 = inlined_call_operand.hbm [shape: f32[4,128], index: 2, kind: output, shape index: {}]  }
   0x1   :  { %8 = vsyncpa [#allocation6], 0 }
   0x2   :  { %9 = vsyncpa [#allocation4], 0  ;;  %s489_s9 = smov [#allocation2]   ;;  %s490_s11 = smov [#allocation5]  }
   0x3   :  { %s16_s10 = sshll.u32 %s489_s9, 4  ;;  %s25_s12 = sshll.u32 %s490_s11, 4  ;;  %s17_s10 = int_to_ptr.vmem [resolvable:$true] %s16_s10  ;;  %s509_s12 = int_to_ptr.vmem [resolvable:$true] %s25_s12 }
   0x4   :  { %s417_s15 = scalar_lea.hbm %s552_s0, 256 }
   0x5   :  { %p418_p0 = scmp.ne.s32.totalorder %s552_s0, %s417_s15  ;;  %p421_p1 = scmp.lt.u32.totalorder %s417_s15, %s552_s0 }
   0x7   :  { %p423_p2 = pnand %p421_p1, %p418_p0 }
   0x9   :  { %426 = shalt.err (!%p423_p2)
}
   0xa   :  { %s427_s20 = scalar_lea.vmem %s17_s10, 256  ;;  %p432_p4 = scmp.lt.s32.totalorder %s17_s10, %s17_s10 }
   0xb   :  { %p428_p3 = scmp.ne.s32.totalorder %s17_s10, %s427_s20  ;;  %p433_p5 = scmp.lt.s32.totalorder %s427_s20, %s427_s20 }
   0xd   :  { %p434_p6 = por %p433_p5, %p432_p4 }
   0xf   :  { %p435_p7 = pnand %p434_p6, %p428_p3 }
  0x11   :  { %438 = shalt.err (!%p435_p7)
}
  0x12   :  { %19 = dma.hbm_to_vmem [thread:$0]  %s552_s0, 256, %s17_s10, [#allocation3]  }
  0x13   :  { %s439_s25 = scalar_lea.hbm %s553_s1, 8192 }
  0x14   :  { %p440_p8 = scmp.ne.s32.totalorder %s553_s1, %s439_s25  ;;  %p443_p9 = scmp.lt.u32.totalorder %s439_s25, %s553_s1 }
  0x16   :  { %p445_p10 = pnand %p443_p9, %p440_p8 }
  0x18   :  { %448 = shalt.err (!%p445_p10)
}
  0x19   :  { %s449_s30 = scalar_lea.vmem %s509_s12, 8192  ;;  %p454_p12 = scmp.lt.s32.totalorder %s509_s12, %s509_s12 }
  0x1a   :  { %p450_p11 = scmp.ne.s32.totalorder %s509_s12, %s449_s30  ;;  %p455_p13 = scmp.lt.s32.totalorder %s449_s30, %s449_s30 }
  0x1c   :  { %p456_p0 = por %p455_p13, %p454_p12 }
  0x1e   :  { %p457_p1 = pnand %p456_p0, %p450_p11 }
  0x20   :  { %460 = shalt.err (!%p457_p1)
}
  0x21   :  { %s491_s0 = smov 128   ;;  %s492_s3 = smov 8  }
  0x22   :  { %31 = dma.hbm_to_vmem [thread:$0]  %s553_s1, 8192, %s509_s12, [#allocation6], %s491_s0, %s491_s0, %s492_s3  }
  0x23   :  { %483 = dma.done.wait [#allocation3], 256  }
  0x24   :  { %484 = vsyncadd [#allocation3], 4294967040 }
  0x25   :  { %485 = dma.done.wait [#allocation6], 8192  }
  0x26   :  { %486 = vsyncadd [#allocation6], 4294959104  ;;  %v58_v0 = vld [vmem:[#allocation5 + $0x80] sm:$0xff]  ;;  %v59_v1 = vld [vmem:[#allocation5 + $0x88] sm:$0xff]  ;;  %s493_s1 = smov [#allocation7]  }
  0x27   :  { %v90_v2 = vld [vmem:[#allocation5 + $0x180] sm:$0xff]  ;;  %v346_v3 = vpack.c.bf16 %v59_v1, %v58_v0  ;;  %v91_v4 = vld [vmem:[#allocation5 + $0x188] sm:$0xff]  ;;  %v60_v11 = vld [vmem:[#allocation5 + $0x90] sm:$0xff]  ;;  %s266_s6 = sshll.u32 %s493_s1, 4  ;;  %s267_s6 = int_to_ptr.vmem [resolvable:$true] %s266_s6 }
  0x28   :  { %v42_v5 = vld [vmem:[#allocation5] sm:$0xff]  ;;  %v43_v6 = vld [vmem:[#allocation5 + $0x8] sm:$0xff]  ;;  %v378_v7 = vpack.c.bf16 %v91_v4, %v90_v2  ;;  %v61_v13 = vld [vmem:[#allocation5 + $0x98] sm:$0xff]  ;;  %s461_s7 = scalar_lea.vmem %s267_s6, 64  ;;  %p466_p3 = scmp.lt.s32.totalorder %s267_s6, %s267_s6 }
  0x29   :  { %v348_v8 = vpack.c.bf16 %v43_v6, %v42_v5  ;;  %v74_v9 = vld [vmem:[#allocation5 + $0x100] sm:$0xff]  ;;  %v75_v10 = vld [vmem:[#allocation5 + $0x108] sm:$0xff]  ;;  %347 = vmatprep.subr.bf16.mxu0 %v346_v3  ;;  %v92_v14 = vld [vmem:[#allocation5 + $0x190] sm:$0xff]  ;;  %v350_v16 = vpack.c.bf16 %v61_v13, %v60_v11  ;;  %p462_p2 = scmp.ne.s32.totalorder %s267_s6, %s461_s7  ;;  %p467_p4 = scmp.lt.s32.totalorder %s461_s7, %s461_s7 }
  0x2a   :  { %v380_v12 = vpack.c.bf16 %v75_v10, %v74_v9  ;;  %v93_v15 = vld [vmem:[#allocation5 + $0x198] sm:$0xff]  ;;  %379 = vmatprep.subr.bf16.mxu1 %v378_v7  ;;  %v44_v18 = vld [vmem:[#allocation5 + $0x10] sm:$0xff]  ;;  %v62_v23 = vld [vmem:[#allocation5 + $0xa0] sm:$0xff] }
  0x2b   :  { %349 = vmatpush3.bf16.msra.mxu0 %v348_v8  ;;  %v382_v17 = vpack.c.bf16 %v93_v15, %v92_v14  ;;  %v45_v19 = vld [vmem:[#allocation5 + $0x18] sm:$0xff]  ;;  %v76_v20 = vld [vmem:[#allocation5 + $0x110] sm:$0xff]  ;;  %v63_v24 = vld [vmem:[#allocation5 + $0xa8] sm:$0xff]  ;;  %p468_p5 = por %p467_p4, %p466_p3 }
  0x2c   :  { %381 = vmatpush3.bf16.msra.mxu1 %v380_v12  ;;  %v352_v21 = vpack.c.bf16 %v45_v19, %v44_v18  ;;  %v77_v22 = vld [vmem:[#allocation5 + $0x118] sm:$0xff]  ;;  %351 = vmatprep.subr.bf16.mxu0 %v350_v16  ;;  %v354_v26 = vpack.c.bf16 %v63_v24, %v62_v23  ;;  %v94_v27 = vld [vmem:[#allocation5 + $0x1a0] sm:$0xff]  ;;  %v95_v28 = vld [vmem:[#allocation5 + $0x1a8] sm:$0xff] }
  0x2d   :  { %383 = vmatprep.subr.bf16.mxu1 %v382_v17  ;;  %v384_v25 = vpack.c.bf16 %v77_v22, %v76_v20  ;;  %v46_v29 = vld [vmem:[#allocation5 + $0x20] sm:$0xff]  ;;  %v386_v30 = vpack.c.bf16 %v95_v28, %v94_v27  ;;  %v47_v31 = vld [vmem:[#allocation5 + $0x28] sm:$0xff]  ;;  %v64_v35 = vld [vmem:[#allocation5 + $0xb0] sm:$0xff]  ;;  %p469_p6 = pnand %p468_p5, %p462_p2 }
  0x2e   :  { %v78_v32 = vld [vmem:[#allocation5 + $0x120] sm:$0xff]  ;;  %v79_v33 = vld [vmem:[#allocation5 + $0x128] sm:$0xff]  ;;  %v356_v34 = vpack.c.bf16 %v47_v31, %v46_v29  ;;  %v65_v36 = vld [vmem:[#allocation5 + $0xb8] sm:$0xff] }
  0x2f   :  { %353 = vmatpush3.bf16.msra.mxu0 %v352_v21  ;;  %v96_v37 = vld [vmem:[#allocation5 + $0x1b0] sm:$0xff]  ;;  %v388_v38 = vpack.c.bf16 %v79_v33, %v78_v32  ;;  %v358_v39 = vpack.c.bf16 %v65_v36, %v64_v35  ;;  %v97_v40 = vld [vmem:[#allocation5 + $0x1b8] sm:$0xff]  ;;  %v66_v46 = vld [vmem:[#allocation5 + $0xc0] sm:$0xff] }
  0x30   :  { %385 = vmatpush3.bf16.msra.mxu1 %v384_v25  ;;  %355 = vmatprep.subr.bf16.mxu0 %v354_v26  ;;  %v48_v41 = vld [vmem:[#allocation5 + $0x30] sm:$0xff]  ;;  %v49_v42 = vld [vmem:[#allocation5 + $0x38] sm:$0xff]  ;;  %v390_v43 = vpack.c.bf16 %v97_v40, %v96_v37  ;;  %v67_v47 = vld [vmem:[#allocation5 + $0xc8] sm:$0xff] }
  0x31   :  { %387 = vmatprep.subr.bf16.mxu1 %v386_v30  ;;  %v80_v44 = vld [vmem:[#allocation5 + $0x130] sm:$0xff]  ;;  %v81_v45 = vld [vmem:[#allocation5 + $0x138] sm:$0xff]  ;;  %v98_v48 = vld [vmem:[#allocation5 + $0x1c0] sm:$0xff]  ;;  %v360_v50 = vpack.c.bf16 %v49_v42, %v48_v41  ;;  %v362_v52 = vpack.c.bf16 %v67_v47, %v66_v46 }
  0x32   :  { %v99_v49 = vld [vmem:[#allocation5 + $0x1c8] sm:$0xff]  ;;  %v392_v51 = vpack.c.bf16 %v81_v45, %v80_v44  ;;  %v50_v53 = vld [vmem:[#allocation5 + $0x40] sm:$0xff]  ;;  %v68_v58 = vld [vmem:[#allocation5 + $0xd0] sm:$0xff] }
  0x33   :  { %357 = vmatpush3.bf16.msra.mxu0 %v356_v34  ;;  %v51_v54 = vld [vmem:[#allocation5 + $0x48] sm:$0xff]  ;;  %v82_v55 = vld [vmem:[#allocation5 + $0x140] sm:$0xff]  ;;  %v394_v56 = vpack.c.bf16 %v99_v49, %v98_v48  ;;  %v69_v59 = vld [vmem:[#allocation5 + $0xd8] sm:$0xff] }
  0x34   :  { %389 = vmatpush3.bf16.msra.mxu1 %v388_v38  ;;  %359 = vmatprep.subr.bf16.mxu0 %v358_v39  ;;  %v83_v57 = vld [vmem:[#allocation5 + $0x148] sm:$0xff]  ;;  %v100_v60 = vld [vmem:[#allocation5 + $0x1d0] sm:$0xff]  ;;  %v101_v61 = vld [vmem:[#allocation5 + $0x1d8] sm:$0xff]  ;;  %v364_v62 = vpack.c.bf16 %v51_v54, %v50_v53  ;;  %v366_v0 = vpack.c.bf16 %v69_v59, %v68_v58 }
  0x35   :  { %391 = vmatprep.subr.bf16.mxu1 %v390_v43  ;;  %v396_v63 = vpack.c.bf16 %v83_v57, %v82_v55  ;;  %v52_v1 = vld [vmem:[#allocation5 + $0x50] sm:$0xff]  ;;  %v53_v2 = vld [vmem:[#allocation5 + $0x58] sm:$0xff]  ;;  %v398_v4 = vpack.c.bf16 %v101_v61, %v100_v60  ;;  %v70_v6 = vld [vmem:[#allocation5 + $0xe0] sm:$0xff] }
  0x36   :  { %v84_v3 = vld [vmem:[#allocation5 + $0x150] sm:$0xff]  ;;  %v85_v5 = vld [vmem:[#allocation5 + $0x158] sm:$0xff]  ;;  %v71_v7 = vld [vmem:[#allocation5 + $0xe8] sm:$0xff]  ;;  %v368_v10 = vpack.c.bf16 %v53_v2, %v52_v1 }
  0x37   :  { %361 = vmatpush3.bf16.msra.mxu0 %v360_v50  ;;  %v102_v8 = vld [vmem:[#allocation5 + $0x1e0] sm:$0xff]  ;;  %v103_v9 = vld [vmem:[#allocation5 + $0x1e8] sm:$0xff]  ;;  %v400_v13 = vpack.c.bf16 %v85_v5, %v84_v3  ;;  %v370_v14 = vpack.c.bf16 %v71_v7, %v70_v6  ;;  %v38_v16 = vld [vmem:[#allocation2] sm:$0xff] }
  0x38   :  { %393 = vmatpush3.bf16.msra.mxu1 %v392_v51  ;;  %363 = vmatprep.subr.bf16.mxu0 %v362_v52  ;;  %v54_v11 = vld [vmem:[#allocation5 + $0x60] sm:$0xff]  ;;  %v55_v12 = vld [vmem:[#allocation5 + $0x68] sm:$0xff]  ;;  %v39_v17 = vld [vmem:[#allocation2 + $0x8] sm:$0xff]  ;;  %v402_v18 = vpack.c.bf16 %v103_v9, %v102_v8  ;;  %v40_v22 = vmul.f32 %v38_v16, %v38_v16 }
  0x39   :  { %395 = vmatprep.subr.bf16.mxu1 %v394_v56  ;;  %v86_v15 = vld [vmem:[#allocation5 + $0x160] sm:$0xff]  ;;  %v87_v19 = vld [vmem:[#allocation5 + $0x168] sm:$0xff]  ;;  %v72_v20 = vld [vmem:[#allocation5 + $0xf0] sm:$0xff]  ;;  %v41_v23 = vmul.f32 %v39_v17, %v39_v17  ;;  %v372_v26 = vpack.c.bf16 %v55_v12, %v54_v11 }
  0x3a   :  { %v73_v21 = vld [vmem:[#allocation5 + $0xf8] sm:$0xff]  ;;  %v104_v24 = vld [vmem:[#allocation5 + $0x1f0] sm:$0xff]  ;;  %v108_v27 = vcombine.high %v40_v22, %v40_v22  ;;  %v404_v29 = vpack.c.bf16 %v87_v19, %v86_v15 }
  0x3b   :  { %365 = vmatpush3.bf16.msra.mxu0 %v364_v62  ;;  %v105_v25 = vld [vmem:[#allocation5 + $0x1f8] sm:$0xff]  ;;  %v109_v28 = vcombine.high %v41_v23, %v41_v23  ;;  %v374_v30 = vpack.c.bf16 %v73_v21, %v72_v20  ;;  %v56_v31 = vld [vmem:[#allocation5 + $0x70] sm:$0xff] }
  0x3c   :  { %397 = vmatpush3.bf16.msra.mxu1 %v396_v63  ;;  %367 = vmatprep.subr.bf16.mxu0 %v366_v0  ;;  %v57_v32 = vld [vmem:[#allocation5 + $0x78] sm:$0xff]  ;;  %v406_v33 = vpack.c.bf16 %v105_v25, %v104_v24  ;;  %v88_v34 = vld [vmem:[#allocation5 + $0x170] sm:$0xff] }
  0x3d   :  { %399 = vmatprep.subr.bf16.mxu1 %v398_v4  ;;  %v89_v35 = vld [vmem:[#allocation5 + $0x178] sm:$0xff]  ;;  %176 = vmatprep.mubr.f32.mxu0 %v108_v27  ;;  %v376_v36 = vpack.c.bf16 %v57_v32, %v56_v31 }
  0x3e   :  { %246 = vmatprep.mubr.f32.mxu1 %v109_v28  ;;  %v408_v37 = vpack.c.bf16 %v89_v35, %v88_v34 }
  0x3f   :  { %369 = vmatpush3.bf16.msra.mxu0 %v368_v10 }
  0x40   :  { %401 = vmatpush3.bf16.msra.mxu1 %v400_v13  ;;  %371 = vmatprep.subr.bf16.mxu0 %v370_v14 }
  0x41   :  { %403 = vmatprep.subr.bf16.mxu1 %v402_v18 }
  0x43   :  { %373 = vmatpush3.bf16.msra.mxu0 %v372_v26 }
  0x44   :  { %405 = vmatpush3.bf16.msra.mxu1 %v404_v29  ;;  %375 = vmatprep.subr.bf16.mxu0 %v374_v30 }
  0x45   :  { %407 = vmatprep.subr.bf16.mxu1 %v406_v33 }
  0x47   :  { %377 = vmatpush3.bf16.msra.mxu0 %v376_v36 }
  0x48   :  { %409 = vmatpush3.bf16.msra.mxu1 %v408_v37 }
  0x4a   :  { %177 = vmatmul.mubr.f32.vlgmr.msra.gmra.mrb[0].mxu0 %v40_v22 }
  0x4b   :  { %247 = vmatmul.mubr.f32.vlgmr.msra.gmra.mrb[0].mxu1 %v41_v23 }
 0x11d   :  { %v308_v38 = vpop.f32.mrb[0].mxu0 }
 0x11e   :  { %v343_v39 = vpop.f32.mrb[0].mxu1  ;;  %v309_v40 = vpop.f32.mrb[1].mxu0 }
 0x11f   :  { %v310_v41 = vadd.f32 %v309_v40, %v308_v38  ;;  %v344_v42 = vpop.f32.mrb[1].mxu1 }
 0x120   :  { %v345_v43 = vadd.f32 %v344_v42, %v343_v39 }
 0x122   :  { %v249_v44 = vadd.f32 %v345_v43, %v310_v41 }
 0x124   :  { %415 = vrsqrt.f32 %v249_v44  ;;  %vm254_vm0 = vcmp.eq.f32.partialorder %v249_v44, inf  ;;  %v257_v47 = vand.u32 2147483648, %v249_v44  ;;  %vm256_vm1 = vcmp.eq.f32.partialorder %v249_v44, 0.0 }
 0x12e   :  { %v416_v45 = vpop.eup %415 }
 0x12f   :  { %v253_v46 = vmul.f32 %v416_v45, %v249_v44 }
 0x131   :  { %v255_v48 = vsel %vm254_vm0, %v249_v44, %v253_v46 }
 0x132   :  { %v258_v49 = vsel %vm256_vm1, %v257_v47, %v255_v48 }
 0x133   :  { %259 = vst [vmem:[#allocation7] sm:$0xf] %v258_v49 }
 0x134   :  { %472 = shalt.err (!%p469_p6)
}
 0x135   :  { %s473_s10 = scalar_lea.hbm %s554_s2, 64 }
 0x136   :  { %p474_p7 = scmp.ne.s32.totalorder %s554_s2, %s473_s10  ;;  %p477_p8 = scmp.lt.u32.totalorder %s473_s10, %s554_s2 }
 0x138   :  { %p479_p9 = pnand %p477_p8, %p474_p7 }
 0x13a   :  { %482 = shalt.err (!%p479_p9)
}
 0x13b   :  { %269 = dma.vmem_to_hbm [thread:$0]  %s267_s6, 64, %s554_s2, [#allocation4]  }
 0x13c   :  { %487 = dma.done.wait [#allocation4], 64  }
 0x13d   :  { %488 = vsyncadd [#allocation4], 4294967232 }
 0x13e   :  { %273 = vsyncpa [#allocation3], 1 }
 0x13f   :  { %274 = vsyncpa [#allocation6], 1 }
 0x140   :  { %275 = vsyncpa [#allocation4], 1 }

</bundles_post_ra>
